<compile_context>
chip_gen: v6e
topology: v6e:2x2x1
jax: 0.10.0
libtpu: 0.0.40
codegen_flags: <defaults>
</compile_context>

<pallas_src>
import functools

import jax
import jax.numpy as jnp
from jax.experimental import pallas as pl
from jax.experimental.pallas import tpu as pltpu


def _round_up(x: int, m: int) -> int:
    return ((x + m - 1) // m) * m


# ---------------------------------------------------------------------------
# Kernels
# ---------------------------------------------------------------------------
def _linear_kernel_fused(x_ref, w_ref, b_ref, o_ref):
    """Whole K panel resident: one MXU matmul, bias fused, no scratch."""
    o_ref[...] = (
        jnp.dot(x_ref[...], w_ref[...], preferred_element_type=jnp.float32)
        + b_ref[...].astype(jnp.float32)
    ).astype(o_ref.dtype)


def _linear_kernel_acc(x_ref, w_ref, b_ref, o_ref, acc_ref):
    """K-tiled reduction; bias is folded into the accumulator init (k == 0)."""
    k = pl.program_id(2)

    @pl.when(k == 0)
    def _init():
        acc_ref[...] = jnp.broadcast_to(
            b_ref[...].astype(jnp.float32), acc_ref.shape
        )

    acc_ref[...] += jnp.dot(
        x_ref[...], w_ref[...], preferred_element_type=jnp.float32
    )

    @pl.when(k == pl.num_programs(2) - 1)
    def _finalize():
        o_ref[...] = acc_ref[...].astype(o_ref.dtype)


# ---------------------------------------------------------------------------
# Generation-aware configuration
# ---------------------------------------------------------------------------
def _hw_config():
    try:
        vmem_bytes = pltpu.get_tpu_info().vmem_capacity_bytes
    except Exception:
        vmem_bytes = 64 * 1024 * 1024  # conservative (v7x-sized) fallback
    if vmem_bytes >= 96 * 1024 * 1024:
        # v5e / v6e: 128 MiB physical VMEM -> large resident tiles.
        return dict(tm_cap=512, tn_cap=1024, tk_cap=1024, k_collapse=2048,
                    vmem_limit=96 * 1024 * 1024)
    # v7x: 64 MiB VMEM per TensorCore -> right-sized so double buffering holds.
    return dict(tm_cap=512, tn_cap=512, tk_cap=512, k_collapse=2048,
                vmem_limit=44 * 1024 * 1024)


# ---------------------------------------------------------------------------
# pallas_call wrapper
# ---------------------------------------------------------------------------
@functools.partial(
    jax.jit,
    static_argnames=("tm", "tn", "tk", "multi_k", "vmem_limit", "out_dtype"),
)
def _linear_call(x, w, b2, *, tm, tn, tk, multi_k, vmem_limit, out_dtype):
    M, K = x.shape
    _, N = w.shape
    grid_m = pl.cdiv(M, tm)
    grid_n = pl.cdiv(N, tn)

    cost = pl.CostEstimate(
        flops=2 * M * N * K,
        transcendentals=0,
        bytes_accessed=(
            x.size * x.dtype.itemsize
            + w.size * w.dtype.itemsize
            + b2.size * b2.dtype.itemsize
            + M * N * jnp.dtype(out_dtype).itemsize
        ),
    )

    # TODO(synk): sweep pipeline_mode=pl.Buffered(3) on the x/w specs if
    # profiling shows the weight DMA still exposed after tile enlargement.
    if multi_k:
        grid = (grid_m, grid_n, K // tk)  # K padded to a multiple of tk
        in_specs = [
            pl.BlockSpec((tm, tk), lambda i, j, k: (i, k)),   # x tile
            pl.BlockSpec((tk, tn), lambda i, j, k: (k, j)),   # w tile
            pl.BlockSpec((1, tn), lambda i, j, k: (0, j)),    # bias tile
        ]
        out_specs = pl.BlockSpec((tm, tn), lambda i, j, k: (i, j))
        scratch = [pltpu.VMEM((tm, tn), jnp.float32)]
        kernel = _linear_kernel_acc
        semantics = ("parallel", "parallel", "arbitrary")
    else:
        grid = (grid_m, grid_n)           # whole K panel resident per tile
        in_specs = [
            pl.BlockSpec((tm, tk), lambda i, j: (i, 0)),
            pl.BlockSpec((tk, tn), lambda i, j: (0, j)),
            pl.BlockSpec((1, tn), lambda i, j: (0, j)),
        ]
        out_specs = pl.BlockSpec((tm, tn), lambda i, j: (i, j))
        scratch = []
        kernel = _linear_kernel_fused
        semantics = ("parallel", "parallel")

    return pl.pallas_call(
        kernel,
        out_shape=jax.ShapeDtypeStruct((M, N), out_dtype),
        grid_spec=pltpu.PrefetchScalarGridSpec(
            num_scalar_prefetch=0,
            grid=grid,
            in_specs=in_specs,
            out_specs=out_specs,
            scratch_shapes=scratch,
        ),
        compiler_params=pltpu.CompilerParams(
            dimension_semantics=semantics,
            vmem_limit_bytes=vmem_limit,
        ),
        cost_estimate=cost,
    )(x, w, b2)


# ---------------------------------------------------------------------------
# Public wrapper (matches MyLinear.forward semantics)
# ---------------------------------------------------------------------------
def my_linear(x, weight, bias, *, compute_dtype=None):
    """y = x @ weight + bias.

    compute_dtype: optionally cast x/weight (e.g. jnp.bfloat16) for ~3x MXU
    throughput on v6e/v7x; accumulation, bias add and output remain float32.
    """
    M, K = x.shape
    K2, N = weight.shape
    assert K == K2, "in_features mismatch"
    assert bias.shape == (N,), "bias shape mismatch"

    out_dtype = x.dtype
    if compute_dtype is not None:
        x = x.astype(compute_dtype)
        weight = weight.astype(compute_dtype)

    cfg = _hw_config()
    # Sublane granularity: 16-bit dtypes pack 2x along sublanes.
    m_gran = 16 if jnp.dtype(x.dtype).itemsize == 2 else 8

    # Tile sizes. A block equal to the FULL dimension is always legal (no
    # (8,128) divisibility requirement), so small dims are never padded;
    # large dims use hardware-aligned caps with Pallas handling ragged edges.
    tm = M if M <= cfg["tm_cap"] else cfg["tm_cap"]
    tn = N if N <= cfg["tn_cap"] else cfg["tn_cap"]
    grid_m = pl.cdiv(M, tm)
    grid_n = pl.cdiv(N, tn)

    # v7x has 2 TensorCores: ensure >= 2 iterations on the parallel axes
    # (negligible cost on single-core v5e/v6e).
    if grid_m * grid_n < 2:
        if M >= 2 * m_gran:
            tm = _round_up(-(-M // 2), m_gran)
            grid_m = pl.cdiv(M, tm)
        elif N >= 256:
            tn = _round_up(-(-N // 2), 128)
            grid_n = pl.cdiv(N, tn)

    # K handling: collapse the reduction into a single resident panel whenever
    # it fits (drops accumulator + K-step overhead).  Only for very large K do
    # we tile K, zero-padding K alone (the only axis where garbage in padded
    # reads would corrupt valid outputs).
    if K <= cfg["k_collapse"]:
        tk = K
        multi_k = False
    else:
        Kp = _round_up(K, 128)
        if Kp != K:
            x = jnp.pad(x, ((0, 0), (0, Kp - K)))
            weight = jnp.pad(weight, ((0, Kp - K), (0, 0)))
        tk = (cfg["tk_cap"] // 128) * 128
        while Kp % tk != 0:   # largest tk <= cap that divides Kp exactly
            tk -= 128
        multi_k = True

    b2 = bias.reshape(1, N)

    return _linear_call(
        x, weight, b2,
        tm=int(tm), tn=int(tn), tk=int(tk),
        multi_k=bool(multi_k),
        vmem_limit=int(cfg["vmem_limit"]),
        out_dtype=out_dtype,
    )


# ---------------------------------------------------------------------------
# Self-test
# ---------------------------------------------------------------------------
if __name__ == "__main__":
    def rel_err(a, b):
        return float(jnp.max(jnp.abs(a - b)) / (jnp.max(jnp.abs(b)) + 1e-6))

    # Small shapes consistent with the module: batch=8 rows, in=32, out=128.
    M, IN_FEATURES, OUT_FEATURES = 8, 32, 128
    key = jax.random.PRNGKey(0)
    kx, kw, kb = jax.random.split(key, 3)
    x = jax.random.normal(kx, (M, IN_FEATURES), dtype=jnp.float32)
    weight = jax.random.normal(kw, (IN_FEATURES, OUT_FEATURES), dtype=jnp.float32)
    bias = jax.random.normal(kb, (OUT_FEATURES,), dtype=jnp.float32)

    y = my_linear(x, weight, bias)
    jax.block_until_ready(y)
    assert y.shape == (M, OUT_FEATURES)
    ref = jnp.dot(x, weight, precision=jax.lax.Precision.HIGHEST) + bias
    assert rel_err(y, ref) < 1e-2, f"small-shape mismatch: {rel_err(y, ref)}"

    # Shape exercising multi-tile parallel grid + ragged edges (no padding)
    # and the fused single-K-panel path.
    M2, K2_, N2 = 300, 640, 384
    k2x, k2w, k2b = jax.random.split(jax.random.PRNGKey(1), 3)
    x2 = jax.random.normal(k2x, (M2, K2_), dtype=jnp.float32)
    w2 = jax.random.normal(k2w, (K2_, N2), dtype=jnp.float32)
    b2 = jax.random.normal(k2b, (N2,), dtype=jnp.float32)
    y2 = my_linear(x2, w2, b2)
    jax.block_until_ready(y2)
    ref2 = jnp.dot(x2, w2, precision=jax.lax.Precision.HIGHEST) + b2
    assert rel_err(y2, ref2) < 1e-2, f"tiled path mismatch: {rel_err(y2, ref2)}"

    # Optional bf16-MXU path (f32 accumulation / bias / output): looser tol.
    y3 = my_linear(x2, w2, b2, compute_dtype=jnp.bfloat16)
    jax.block_until_ready(y3)
    assert y3.dtype == x2.dtype
    assert rel_err(y3, ref2) < 4e-2, f"bf16 path mismatch: {rel_err(y3, ref2)}"

    print("KERNEL_OK")
</pallas_src>

<mosaic_0001>
module attributes {stable_mosaic.version = 11 : i64} {
  func.func @_linear_kernel_fused(%arg0: i32, %arg1: i32, %arg2: memref<8x32xf32, #tpu.memory_space<vmem>>, %arg3: memref<32x128xf32, #tpu.memory_space<vmem>>, %arg4: memref<1x128xf32, #tpu.memory_space<vmem>>, %arg5: memref<8x128xf32, #tpu.memory_space<vmem>>) attributes {dimension_semantics = [#tpu.dimension_semantics<parallel>, #tpu.dimension_semantics<parallel>], iteration_bounds = array<i64: 1, 1>, scalar_prefetch = 0 : i64, scratch_operands = 0 : i64, tpu.core_type = #tpu.core_type<tc>, window_params = [{transform_indices = @transform_0, window_bounds = array<i64: 8, 32>}, {transform_indices = @transform_1, window_bounds = array<i64: 32, 128>}, {transform_indices = @transform_2, window_bounds = array<i64: 1, 128>}, {transform_indices = @transform_3, window_bounds = array<i64: 8, 128>}]} {
    %c0 = arith.constant 0 : index
    %c0_0 = arith.constant 0 : index
    %0 = vector.load %arg2[%c0, %c0_0] : memref<8x32xf32, #tpu.memory_space<vmem>>, vector<8x32xf32>
    %c0_1 = arith.constant 0 : index
    %c0_2 = arith.constant 0 : index
    %1 = vector.load %arg3[%c0_1, %c0_2] : memref<32x128xf32, #tpu.memory_space<vmem>>, vector<32x128xf32>
    %cst = arith.constant dense<0.000000e+00> : vector<8x128xf32>
    %2 = tpu.matmul %0, %1, %cst {dimension_numbers = #tpu.dot_dimension_numbers<[1], [0], [0], [1], [0, 0, 1, 1], [], []>} : vector<8x32xf32>, vector<32x128xf32>, vector<8x128xf32> -> vector<8x128xf32>
    %c0_3 = arith.constant 0 : index
    %c0_4 = arith.constant 0 : index
    %3 = vector.load %arg4[%c0_3, %c0_4] : memref<1x128xf32, #tpu.memory_space<vmem>>, vector<1x128xf32>
    %4 = vector.broadcast %3 : vector<1x128xf32> to vector<8x128xf32>
    %5 = arith.addf %2, %4 : vector<8x128xf32>
    %c0_5 = arith.constant 0 : index
    %c0_6 = arith.constant 0 : index
    %6 = vector.load %arg5[%c0_5, %c0_6] : memref<8x128xf32, #tpu.memory_space<vmem>>, vector<8x128xf32>
    tpu.vector_store %arg5[%c0_5, %c0_6], %5 {strides = array<i32>} : memref<8x128xf32, #tpu.memory_space<vmem>>, vector<8x128xf32>,
    return
  }
  func.func @transform_0(%arg0: i32, %arg1: i32) -> (i32, i32) {
    %c0_i32 = arith.constant 0 : i32
    %c0_i32_0 = arith.constant 0 : i32
    return %arg0, %c0_i32 : i32, i32
  }
  func.func @transform_1(%arg0: i32, %arg1: i32) -> (i32, i32) {
    %c0_i32 = arith.constant 0 : i32
    %c0_i32_0 = arith.constant 0 : i32
    return %c0_i32, %arg1 : i32, i32
  }
  func.func @transform_2(%arg0: i32, %arg1: i32) -> (i32, i32) {
    %c0_i32 = arith.constant 0 : i32
    %c0_i32_0 = arith.constant 0 : i32
    return %c0_i32, %arg1 : i32, i32
  }
  func.func @transform_3(%arg0: i32, %arg1: i32) -> (i32, i32) {
    %c0_i32 = arith.constant 0 : i32
    return %arg0, %arg1 : i32, i32
  }
}

</mosaic_0001>

<bundles_post_ra>
// kernel: _linear_call.1
= control target key start
LH: loop header
LB: loop body
LE: loop exit
PB: predicated region body
PF: predicated region fallthrough
CT: control target
= control target key end

     0   :  { %8 = vsyncpa [#allocation3], 0  ;;  %s274_s0 = inlined_call_operand.hbm [shape: f32[8,32], index: 0, kind: input, shape index: {}]   ;;  %s275_s1 = inlined_call_operand.hbm [shape: f32[32,128], index: 1, kind: input, shape index: {}]   ;;  %s276_s2 = inlined_call_operand.vmem [shape: f32[1,128], index: 2, kind: input, shape index: {}]   ;;  %s277_s3 = inlined_call_operand.hbm [shape: f32[8,128], index: 3, kind: output, shape index: {}]  }
   0x1   :  { %9 = vsyncpa [#allocation6], 0 }
   0x2   :  { %10 = vsyncpa [#allocation4], 0  ;;  %s235_s12 = smov [#allocation2]   ;;  %s236_s14 = smov [#allocation5]  }
   0x3   :  { %s17_s13 = sshll.u32 %s235_s12, 4  ;;  %s26_s15 = sshll.u32 %s236_s14, 4  ;;  %s18_s13 = int_to_ptr.vmem [resolvable:$true] %s17_s13  ;;  %s27_s15 = int_to_ptr.vmem [resolvable:$true] %s26_s15 }
   0x4   :  { %s177_s16 = scalar_lea.vmem %s18_s13, 128  ;;  %p182_p1 = scmp.lt.s32.totalorder %s18_s13, %s18_s13 }
   0x5   :  { %p178_p0 = scmp.ne.s32.totalorder %s18_s13, %s177_s16  ;;  %p183_p2 = scmp.lt.s32.totalorder %s177_s16, %s177_s16 }
   0x7   :  { %p184_p3 = por %p183_p2, %p182_p1 }
   0x9   :  { %p185_p4 = pnand %p184_p3, %p178_p0 }
   0xb   :  { %188 = shalt.err (!%p185_p4)
}
   0xc   :  { %20 = dma.hbm_to_vmem [thread:$0]  %s274_s0, 128, %s18_s13, [#allocation3]  }
   0xd   :  { %s197_s19 = scalar_lea.vmem %s27_s15, 512  ;;  %p202_p6 = scmp.lt.s32.totalorder %s27_s15, %s27_s15 }
   0xe   :  { %p198_p5 = scmp.ne.s32.totalorder %s27_s15, %s197_s19  ;;  %p203_p7 = scmp.lt.s32.totalorder %s197_s19, %s197_s19 }
  0x10   :  { %p204_p8 = por %p203_p7, %p202_p6 }
  0x12   :  { %p205_p9 = pnand %p204_p8, %p198_p5 }
  0x14   :  { %208 = shalt.err (!%p205_p9)
}
  0x15   :  { %s237_s20 = smov 128   ;;  %s238_s21 = smov 8  }
  0x16   :  { %32 = dma.hbm_to_vmem [thread:$0]  %s275_s1, 512, %s27_s15, [#allocation6], %s237_s20, %s237_s20, %s238_s21  }
  0x17   :  { %229 = dma.done.wait [#allocation3], 128  }
  0x18   :  { %230 = vsyncadd [#allocation3], 4294967168 }
  0x19   :  { %231 = dma.done.wait [#allocation6], 512  }
  0x1a   :  { %232 = vsyncadd [#allocation6], 4294966784  ;;  %v239_v0 = vmov 0.0   ;;  %vm240_vm0 = vmmov 0   ;;  %v45_v1 = vld [vmem:[#allocation5 + $0x18] sm:$0xff]  ;;  %v44_v2 = vld [vmem:[#allocation5 + $0x10] sm:$0xff] }
  0x1b   :  { %151 = vmatprep.subr.mxu0 %v239_v0  ;;  %159 = vmatprep.mubr.msk.f32.mxu0 %vm240_vm0, %v239_v0  ;;  %v43_v3 = vld [vmem:[#allocation5 + $0x8] sm:$0xff]  ;;  %v42_v4 = vld [vmem:[#allocation5] sm:$0xff]  ;;  %v41_v5 = vld [vmem:[#allocation2] sm:$0xff]  ;;  %vm53_vm1 = vcmask 261120   ;;  %s241_s24 = smov [#allocation7]  }
  0x1c   :  { %152 = vmatpush3.msra.mxu0 %v45_v1  ;;  %v144_v6 = vld [vmem:[%s276_s2] ss:$0 sm:$0xff]  ;;  %s134_s25 = sshll.u32 %s241_s24, 4  ;;  %s135_s25 = int_to_ptr.vmem [resolvable:$true] %s134_s25 }
  0x1d   :  { %153 = vmatprep.subr.mxu0 %v239_v0  ;;  %s209_s26 = scalar_lea.vmem %s135_s25, 128  ;;  %p214_p11 = scmp.lt.s32.totalorder %s135_s25, %s135_s25 }
  0x1e   :  { %154 = vmatpush3.msra.mxu0 %v44_v2  ;;  %p210_p10 = scmp.ne.s32.totalorder %s135_s25, %s209_s26  ;;  %p215_p12 = scmp.lt.s32.totalorder %s209_s26, %s209_s26 }
  0x1f   :  { %155 = vmatprep.subr.mxu0 %v239_v0 }
  0x20   :  { %156 = vmatpush3.msra.mxu0 %v43_v3  ;;  %p216_p13 = por %p215_p12, %p214_p11 }
  0x21   :  { %157 = vmatprep.subr.mxu0 %v239_v0 }
  0x22   :  { %158 = vmatpush3.msra.mxu0 %v42_v4  ;;  %p217_p0 = pnand %p216_p13, %p210_p10 }
  0x23   :  { %160 = vmatmul.mubr.msk.f32.vlgmr.msra.gmra.mxu0 %vm53_vm1, %v41_v5 }
  0xe3   :  { %v123_v7 = vpop.f32.mrf.mxu0 }
  0xe4   :  { %v124_v8 = vadd.f32 %v144_v6, %v123_v7 }
  0xe5   :  { %v161_v9 = vpop.f32.mrf.mxu0 }
  0xe6   :  { %127 = vst [vmem:[#allocation7] sm:$0xff] %v124_v8 }
  0xe7   :  { %220 = shalt.err (!%p217_p0)
}
  0xe8   :  { %137 = dma.vmem_to_hbm [thread:$0]  %s135_s25, 128, %s277_s3, [#allocation4]  }
  0xe9   :  { %233 = dma.done.wait [#allocation4], 128  }
  0xea   :  { %234 = vsyncadd [#allocation4], 4294967168 }
  0xeb   :  { %141 = vsyncpa [#allocation3], 1 }
  0xec   :  { %142 = vsyncpa [#allocation6], 1 }
  0xed   :  { %143 = vsyncpa [#allocation4], 1 }

</bundles_post_ra>
